<compile_context>
chip_gen: v6e
topology: v6e:2x2x1
jax: 0.10.0
libtpu: 0.0.40
codegen_flags: <defaults>
</compile_context>

<pallas_src>
import numpy as np
import jax
import jax.numpy as jnp
from jax.experimental import pallas as pl
from jax.experimental.pallas import tpu as pltpu


def _round_up(a: int, b: int) -> int:
    return (a + b - 1) // b * b


def _choose_tiles(B: int, Np: int, Kp: int):
    """Pick (bm, tn) so ~5 live (bm, tn) f32 temporaries plus the double-buffered
    input/output blocks fit a conservative VMEM budget on v5e/v6e/v7x."""
    bm = min(_round_up(max(B, 1), 8), 256)   # MXU-friendly batch tile, multiple of 8
    tn = Np if Np <= 2048 else 2048          # gaussian-axis tile, multiple of 128

    budget = 24 << 20                        # live-set budget (bytes), safe on v7x's 64 MiB

    def live_bytes(bm_, tn_):
        temps = 5 * bm_ * tn_ * 4            # dx/dy/dz/d2/pdf
        outb = 3 * bm_ * Kp * 4              # double-buffered out + acc scratch
        gbuf = 2 * tn_ * Kp * 4              # double-buffered G chunk
        xbuf = 2 * bm_ * 128 * 4             # x tile (lane-padded)
        mbuf = 2 * 8 * tn_ * 4               # means^T chunk (sublane-padded)
        return temps + outb + gbuf + xbuf + mbuf

    while live_bytes(bm, tn) > budget and tn > 1024:   # 2048 -> 1024 (stays /128)
        tn //= 2
    while live_bytes(bm, tn) > budget and bm > 64:     # stays a multiple of 8
        bm //= 2
    return bm, tn


def _make_gmm_kernel(std: float):
    inv_two_var = 1.0 / (2.0 * std * std)

    def kernel(x_ref, mT_ref, g_ref, o_ref, acc_ref):
        n = pl.program_id(1)

        @pl.when(n == 0)
        def _():
            acc_ref[...] = jnp.zeros_like(acc_ref)

        x = x_ref[...]                                   # (bm, 3)
        mT = mT_ref[...]                                 # (3, tn)

        # Squared distance on the VPU: unrolled 3-term sum of squared diffs
        # (no degenerate contraction-dim-3 MXU matmul, no XLU reductions).
        dx = x[:, 0:1] - mT[0:1, :]                      # (bm, tn)
        dy = x[:, 1:2] - mT[1:2, :]
        dz = x[:, 2:3] - mT[2:3, :]
        d2 = dx * dx + dy * dy + dz * dz                 # (bm, tn)

        # exp rides the EUP slot. weights * norm_const are folded into G's rows,
        # so there is no per-tile (bm, tn) weight multiply on the VALU.
        pdf = jnp.exp(-d2 * inv_two_var)                 # (bm, tn)

        # Segment-sum over this gaussian chunk: lane-dense MXU matmul.
        acc_ref[...] += jnp.dot(pdf, g_ref[...],
                                preferred_element_type=jnp.float32,
                                precision=jax.lax.Precision.HIGHEST)

        @pl.when(n == pl.num_programs(1) - 1)
        def _():
            o_ref[...] = acc_ref[...]

    return kernel


def gmm_batch_positions(x, mean_positions, weights, gaussian_indices, n_groups, variance):
    """x: (B, 3); mean_positions: (N, 3); weights: (N,); gaussian_indices: (N,) int32.
    Returns (B, n_groups) float32."""
    B = int(x.shape[0])
    N = int(mean_positions.shape[0])
    K = int(n_groups)
    std = float(np.sqrt(variance))
    norm_const = 1.0 / ((2.0 * np.pi) ** 1.5 * std ** 3)

    # Lane-dense padding for the gaussian and group axes.
    Np = _round_up(max(N, 1), 128)
    Kp = _round_up(max(K, 1), 128)

    bm, tn = _choose_tiles(B, Np, Kp)
    Np = _round_up(Np, tn)
    B_pad = _round_up(B, bm)

    xf = jnp.asarray(x, jnp.float32)
    x_pad = jnp.zeros((B_pad, 3), jnp.float32).at[:B, :].set(xf)

    mT = jnp.zeros((3, Np), jnp.float32).at[:, :N].set(
        jnp.transpose(jnp.asarray(mean_positions, jnp.float32)))

    # One-hot gather matrix built host-side ONCE (hoisted out of the kernel), with the
    # per-gaussian weight and the Gaussian normalization constant folded into its rows.
    # Padded gaussians get all-zero rows -> zero contribution.
    idx = jnp.asarray(gaussian_indices, jnp.int32)
    scaled_w = jnp.asarray(weights, jnp.float32) * jnp.float32(norm_const)
    g_rows = (idx[:, None] == jnp.arange(K, dtype=jnp.int32)[None, :]).astype(jnp.float32)
    g_rows = g_rows * scaled_w[:, None]
    G = jnp.zeros((Np, Kp), jnp.float32).at[:N, :K].set(g_rows)

    kernel = _make_gmm_kernel(std)

    out = pl.pallas_call(
        kernel,
        out_shape=jax.ShapeDtypeStruct((B_pad, Kp), jnp.float32),
        grid_spec=pltpu.PrefetchScalarGridSpec(
            num_scalar_prefetch=0,
            grid=(B_pad // bm, Np // tn),
            in_specs=[
                pl.BlockSpec((bm, 3), lambda i, n: (i, 0)),    # x batch tile
                pl.BlockSpec((3, tn), lambda i, n: (0, n)),    # means^T chunk
                pl.BlockSpec((tn, Kp), lambda i, n: (n, 0)),   # weighted one-hot chunk
            ],
            out_specs=pl.BlockSpec((bm, Kp), lambda i, n: (i, 0)),
            scratch_shapes=[pltpu.VMEM((bm, Kp), jnp.float32)],  # group accumulator
        ),
        compiler_params=pltpu.CompilerParams(
            dimension_semantics=("parallel", "arbitrary"),
            vmem_limit_bytes=48 * 1024 * 1024,
        ),
    )(x_pad, mT, G)

    return out[:B, :K]


if __name__ == "__main__":
    # Deterministic setup mirroring the torch module's __init__.
    N_list = [3, 5]                 # two groups of gaussians
    N_total = sum(N_list)
    K = len(N_list)
    variance = 0.5
    B = 64

    key = jax.random.PRNGKey(0)
    kx, km = jax.random.split(key)
    x = jax.random.normal(kx, (B, 3), dtype=jnp.float32)
    mean_positions = jax.random.normal(km, (N_total, 3), dtype=jnp.float32)  # "initial_guesses"
    weights = jnp.full((N_total,), 0.2, dtype=jnp.float32)
    gaussian_indices = jnp.asarray(
        np.concatenate([[i] * n for i, n in enumerate(N_list)]), dtype=jnp.int32)

    out = gmm_batch_positions(x, mean_positions, weights, gaussian_indices, K, variance)
    out = jax.block_until_ready(out)

    # Pure-JAX reference (same math as the torch forward, f32 accumulation).
    std = float(np.sqrt(variance))
    d2 = jnp.sum((x[:, None, :] - mean_positions[None, :, :]) ** 2, axis=2)
    pdf = jnp.exp(-d2 / (2 * std ** 2)) / ((2 * np.pi) ** 1.5 * std ** 3) * weights
    onehot = (gaussian_indices[:, None] == jnp.arange(K)[None, :]).astype(jnp.float32)
    ref = pdf @ onehot

    assert out.shape == (B, K)
    np.testing.assert_allclose(np.asarray(out), np.asarray(ref), rtol=1e-4, atol=1e-6)
    print("KERNEL_OK")
</pallas_src>

<mosaic_0001>
module attributes {stable_mosaic.version = 11 : i64} {
  func.func @kernel(%arg0: i32, %arg1: i32, %arg2: memref<64x3xf32, #tpu.memory_space<vmem>>, %arg3: memref<3x128xf32, #tpu.memory_space<vmem>>, %arg4: memref<128x128xf32, #tpu.memory_space<vmem>>, %arg5: memref<64x128xf32, #tpu.memory_space<vmem>>, %arg6: memref<64x128xf32, #tpu.memory_space<vmem>>) attributes {dimension_semantics = [#tpu.dimension_semantics<parallel>, #tpu.dimension_semantics<arbitrary>], iteration_bounds = array<i64: 1, 1>, scalar_prefetch = 0 : i64, scratch_operands = 1 : i64, tpu.core_type = #tpu.core_type<tc>, window_params = [{transform_indices = @transform_0, window_bounds = array<i64: 64, 3>}, {transform_indices = @transform_1, window_bounds = array<i64: 3, 128>}, {transform_indices = @transform_2, window_bounds = array<i64: 128, 128>}, {transform_indices = @transform_3, window_bounds = array<i64: 64, 128>}]} {
    %c0_i32 = arith.constant 0 : i32
    %0 = arith.cmpi eq, %arg1, %c0_i32 : i32
    %1 = arith.extui %0 : i1 to i32
    %c0_i32_0 = arith.constant 0 : i32
    %2 = arith.cmpi ne, %1, %c0_i32_0 : i32
    scf.if %2 {
      %cst_14 = arith.constant 0.000000e+00 : f32
      %38 = vector.broadcast %cst_14 : f32 to vector<64x128xf32>
      %c0_15 = arith.constant 0 : index
      %c0_16 = arith.constant 0 : index
      %39 = vector.load %arg6[%c0_15, %c0_16] : memref<64x128xf32, #tpu.memory_space<vmem>>, vector<64x128xf32>
      tpu.vector_store %arg6[%c0_15, %c0_16], %38 {strides = array<i32>} : memref<64x128xf32, #tpu.memory_space<vmem>>, vector<64x128xf32>,
    } else {
    }
    %c0 = arith.constant 0 : index
    %c0_1 = arith.constant 0 : index
    %3 = vector.load %arg2[%c0, %c0_1] : memref<64x3xf32, #tpu.memory_space<vmem>>, vector<64x3xf32>
    %c0_2 = arith.constant 0 : index
    %c0_3 = arith.constant 0 : index
    %4 = vector.load %arg3[%c0_2, %c0_3] : memref<3x128xf32, #tpu.memory_space<vmem>>, vector<3x128xf32>
    %5 = vector.extract_strided_slice %3 {offsets = [0, 0], sizes = [64, 1], strides = [1, 1]} : vector<64x3xf32> to vector<64x1xf32>
    %6 = vector.extract_strided_slice %4 {offsets = [0, 0], sizes = [1, 128], strides = [1, 1]} : vector<3x128xf32> to vector<1x128xf32>
    %7 = vector.broadcast %5 : vector<64x1xf32> to vector<64x128xf32>
    %8 = vector.broadcast %6 : vector<1x128xf32> to vector<64x128xf32>
    %9 = arith.subf %7, %8 : vector<64x128xf32>
    %10 = vector.extract_strided_slice %3 {offsets = [0, 1], sizes = [64, 1], strides = [1, 1]} : vector<64x3xf32> to vector<64x1xf32>
    %11 = vector.extract_strided_slice %4 {offsets = [1, 0], sizes = [1, 128], strides = [1, 1]} : vector<3x128xf32> to vector<1x128xf32>
    %12 = vector.broadcast %10 : vector<64x1xf32> to vector<64x128xf32>
    %13 = vector.broadcast %11 : vector<1x128xf32> to vector<64x128xf32>
    %14 = arith.subf %12, %13 : vector<64x128xf32>
    %15 = vector.extract_strided_slice %3 {offsets = [0, 2], sizes = [64, 1], strides = [1, 1]} : vector<64x3xf32> to vector<64x1xf32>
    %16 = vector.extract_strided_slice %4 {offsets = [2, 0], sizes = [1, 128], strides = [1, 1]} : vector<3x128xf32> to vector<1x128xf32>
    %17 = vector.broadcast %15 : vector<64x1xf32> to vector<64x128xf32>
    %18 = vector.broadcast %16 : vector<1x128xf32> to vector<64x128xf32>
    %19 = arith.subf %17, %18 : vector<64x128xf32>
    %20 = arith.mulf %9, %9 : vector<64x128xf32>
    %21 = arith.mulf %14, %14 : vector<64x128xf32>
    %22 = arith.addf %20, %21 : vector<64x128xf32>
    %23 = arith.mulf %19, %19 : vector<64x128xf32>
    %24 = arith.addf %22, %23 : vector<64x128xf32>
    %cst = arith.constant 0.000000e+00 : f32
    %25 = vector.broadcast %cst : f32 to vector<64x128xf32>
    %26 = arith.subf %25, %24 : vector<64x128xf32>
    %cst_4 = arith.constant 1.000000e+00 : f32
    %27 = vector.broadcast %cst_4 : f32 to vector<64x128xf32>
    %28 = arith.mulf %26, %27 : vector<64x128xf32>
    %29 = math.exp %28 : vector<64x128xf32>
    %c0_5 = arith.constant 0 : index
    %c0_6 = arith.constant 0 : index
    %30 = vector.load %arg6[%c0_5, %c0_6] : memref<64x128xf32, #tpu.memory_space<vmem>>, vector<64x128xf32>
    %c0_7 = arith.constant 0 : index
    %c0_8 = arith.constant 0 : index
    %31 = vector.load %arg4[%c0_7, %c0_8] : memref<128x128xf32, #tpu.memory_space<vmem>>, vector<128x128xf32>
    %cst_9 = arith.constant dense<0.000000e+00> : vector<64x128xf32>
    %32 = tpu.matmul %29, %31, %cst_9 {dimension_numbers = #tpu.dot_dimension_numbers<[1], [0], [0], [1], [0, 0, 1, 1], [], []>, precision = #tpu.contract_precision<fp32>} : vector<64x128xf32>, vector<128x128xf32>, vector<64x128xf32> -> vector<64x128xf32>
    %33 = arith.addf %30, %32 : vector<64x128xf32>
    %c0_10 = arith.constant 0 : index
    %c0_11 = arith.constant 0 : index
    %34 = vector.load %arg6[%c0_10, %c0_11] : memref<64x128xf32, #tpu.memory_space<vmem>>, vector<64x128xf32>
    tpu.vector_store %arg6[%c0_10, %c0_11], %33 {strides = array<i32>} : memref<64x128xf32, #tpu.memory_space<vmem>>, vector<64x128xf32>,
    %c0_i32_12 = arith.constant 0 : i32
    %35 = arith.cmpi eq, %arg1, %c0_i32_12 : i32
    %36 = arith.extui %35 : i1 to i32
    %c0_i32_13 = arith.constant 0 : i32
    %37 = arith.cmpi ne, %36, %c0_i32_13 : i32
    scf.if %37 {
      %c0_14 = arith.constant 0 : index
      %c0_15 = arith.constant 0 : index
      %38 = vector.load %arg6[%c0_14, %c0_15] : memref<64x128xf32, #tpu.memory_space<vmem>>, vector<64x128xf32>
      %c0_16 = arith.constant 0 : index
      %c0_17 = arith.constant 0 : index
      %39 = vector.load %arg5[%c0_16, %c0_17] : memref<64x128xf32, #tpu.memory_space<vmem>>, vector<64x128xf32>
      tpu.vector_store %arg5[%c0_16, %c0_17], %38 {strides = array<i32>} : memref<64x128xf32, #tpu.memory_space<vmem>>, vector<64x128xf32>,
    } else {
    }
    return
  }
  func.func @transform_0(%arg0: i32, %arg1: i32) -> (i32, i32) {
    %c0_i32 = arith.constant 0 : i32
    %c0_i32_0 = arith.constant 0 : i32
    return %arg0, %c0_i32 : i32, i32
  }
  func.func @transform_1(%arg0: i32, %arg1: i32) -> (i32, i32) {
    %c0_i32 = arith.constant 0 : i32
    %c0_i32_0 = arith.constant 0 : i32
    return %c0_i32, %arg1 : i32, i32
  }
  func.func @transform_2(%arg0: i32, %arg1: i32) -> (i32, i32) {
    %c0_i32 = arith.constant 0 : i32
    %c0_i32_0 = arith.constant 0 : i32
    return %arg1, %c0_i32 : i32, i32
  }
  func.func @transform_3(%arg0: i32, %arg1: i32) -> (i32, i32) {
    %c0_i32 = arith.constant 0 : i32
    %c0_i32_0 = arith.constant 0 : i32
    return %arg0, %c0_i32 : i32, i32
  }
}

</mosaic_0001>

<bundles_post_ra>
// kernel: tpu_custom_call.1
= control target key start
LH: loop header
LB: loop body
LE: loop exit
PB: predicated region body
PF: predicated region fallthrough
CT: control target
= control target key end

     0   :  { %8 = vsyncpa [#allocation4], 0  ;;  %s2309_s0 = inlined_call_operand.vmem [shape: f32[64,3], index: 0, kind: input, shape index: {}]   ;;  %s2310_s1 = inlined_call_operand.vmem [shape: f32[3,128], index: 1, kind: input, shape index: {}]   ;;  %s2311_s2 = inlined_call_operand.hbm [shape: f32[128,128], index: 2, kind: input, shape index: {}]   ;;  %s2312_s3 = inlined_call_operand.hbm [shape: f32[64,128], index: 3, kind: output, shape index: {}]  }
   0x1   :  { %9 = vsyncpa [#allocation5], 0  ;;  %s1764_s12 = smov [#allocation3]  }
   0x2   :  { %s19_s13 = sshll.u32 %s1764_s12, 4  ;;  %s20_s13 = int_to_ptr.vmem [resolvable:$true] %s19_s13 }
   0x3   :  { %s1728_s14 = scalar_lea.vmem %s20_s13, 2048  ;;  %p1733_p1 = scmp.lt.s32.totalorder %s20_s13, %s20_s13 }
   0x4   :  { %p1729_p0 = scmp.ne.s32.totalorder %s20_s13, %s1728_s14  ;;  %p1734_p2 = scmp.lt.s32.totalorder %s1728_s14, %s1728_s14 }
   0x6   :  { %p1735_p3 = por %p1734_p2, %p1733_p1 }
   0x8   :  { %p1736_p4 = pnand %p1735_p3, %p1729_p0 }
   0xa   :  { %1739 = shalt.err (!%p1736_p4)
}
   0xb   :  { %s1765_s15 = smov 128   ;;  %s1766_s16 = smov 8  }
   0xc   :  { %25 = dma.hbm_to_vmem [thread:$0]  %s2311_s2, 2048, %s20_s13, [#allocation4], %s1765_s15, %s1765_s15, %s1766_s16  }
   0xd   :  { %1760 = dma.done.wait [#allocation4], 2048  }
   0xe   :  { %1761 = vsyncadd [#allocation4], 4294965248  ;;  %v1767_v0 = vmov 0   ;;  %v42_v1 = vld [vmem:[%s2309_s0 + $0x8] sm:$0xff]  ;;  %v41_v2 = vld [vmem:[%s2309_s0] sm:$0xff]  ;;  %v1768_v12 = vmov 1  }
   0xf   :  { %1689 = vset.pattern.permute.xlu1 %v1767_v0  ;;  %1687 = vset.pattern.permute.xlu0 %v1767_v0  ;;  %v277_v3 = vld [vmem:[#allocation3 + $0x78] sm:$0xff]  ;;  %v276_v4 = vld [vmem:[#allocation3 + $0x70] sm:$0xff]  ;;  %v275_v5 = vld [vmem:[#allocation3 + $0x68] sm:$0xff]  ;;  %v1769_v27 = vmov 2  }
  0x10   :  { %57 = vperm.xlu1 %1689, %v42_v1   ;;  %52 = vperm.xlu0 %1687, %v41_v2   ;;  %v1805_v6 = vand.u32 4294901760, %v277_v3  ;;  %v1807_v7 = vand.u32 4294901760, %v276_v4  ;;  %v1809_v8 = vand.u32 4294901760, %v275_v5  ;;  %v274_v9 = vld [vmem:[#allocation3 + $0x60] sm:$0xff]  ;;  %v273_v10 = vld [vmem:[#allocation3 + $0x58] sm:$0xff]  ;;  %v272_v11 = vld [vmem:[#allocation3 + $0x50] sm:$0xff] }
  0x11   :  { %v1813_v13 = vand.u32 4294901760, %v274_v9  ;;  %v1815_v14 = vand.u32 4294901760, %v273_v10  ;;  %v271_v18 = vld [vmem:[#allocation3 + $0x48] sm:$0xff]  ;;  %v1830_v20 = vand.u32 4294901760, %v272_v11  ;;  %v270_v23 = vld [vmem:[#allocation3 + $0x40] sm:$0xff]  ;;  %v269_v33 = vld [vmem:[#allocation3 + $0x38] sm:$0xff] }
  0x12   :  { %v1818_v15 = vsub.f32 %v277_v3, %v1805_v6  ;;  %v1821_v16 = vsub.f32 %v276_v4, %v1807_v7  ;;  %v1824_v17 = vsub.f32 %v275_v5, %v1809_v8  ;;  %1416 = vmatprep.subr.mxu0 %v1805_v6  ;;  %v1846_v26 = vand.u32 4294901760, %v271_v18  ;;  %v1866_v35 = vld [vmem:[%s2309_s0 + $0x10] sm:$0xff]  ;;  %v1871_v36 = vld [vmem:[%s2309_s0 + $0x18] sm:$0xff]  ;;  %v267_v46 = vld [vmem:[#allocation3 + $0x28] sm:$0xff] }
  0x13   :  { %v1827_v19 = vsub.f32 %v274_v9, %v1813_v13  ;;  %1417 = vmatpush3.msra.mxu0 %v1805_v6  ;;  %v1843_v25 = vsub.f32 %v273_v10, %v1815_v14  ;;  %v1858_v31 = vsub.f32 %v272_v11, %v1830_v20  ;;  %v1860_v32 = vand.u32 4294901760, %v270_v23  ;;  %v268_v40 = vld [vmem:[#allocation3 + $0x30] sm:$0xff]  ;;  %v1902_v48 = vld [vmem:[%s2309_s0 + $0x28] sm:$0xff]  ;;  %v266_v52 = vld [vmem:[#allocation3 + $0x20] sm:$0xff] }
  0x14   :  { %1690 = vset.pattern.permute.xlu1 %v1768_v12  ;;  %1688 = vset.pattern.permute.xlu0 %v1768_v12  ;;  %v1833_v21 = vand.u32 4294901760, %v1818_v15  ;;  %v1836_v22 = vand.u32 4294901760, %v1821_v16  ;;  %v1840_v24 = vand.u32 4294901760, %v1824_v17  ;;  %v1880_v39 = vsub.f32 %v271_v18, %v1846_v26  ;;  %v265_v58 = vld [vmem:[#allocation3 + $0x18] sm:$0xff]  ;;  %v263_v10 = vld [vmem:[#allocation3 + $0x8] sm:$0xff] }
  0x15   :  { %107 = vperm.xlu1 %1690, %v42_v1   ;;  %103 = vperm.xlu0 %1688, %v41_v2   ;;  %v1855_v30 = vand.u32 4294901760, %v1827_v19  ;;  %v1876_v38 = vand.u32 4294901760, %v1843_v25  ;;  %v1883_v42 = vand.u32 4294901760, %v269_v33  ;;  %v1890_v44 = vand.u32 4294901760, %v1858_v31  ;;  %v1933_v61 = vld [vmem:[%s2309_s0 + $0x38] sm:$0xff] }
  0x16   :  { %1418 = vmatprep.subr.mxu0 %v1807_v7  ;;  %v443_v28 = vsub.f32 %v1818_v15, %v1833_v21  ;;  %v450_v29 = vsub.f32 %v1821_v16, %v1836_v22  ;;  %v457_v37 = vsub.f32 %v1824_v17, %v1840_v24  ;;  %v1893_v45 = vsub.f32 %v270_v23, %v1860_v32 }
  0x17   :  { %1419 = vmatpush3.msra.mxu0 %v1807_v7  ;;  %v464_v43 = vsub.f32 %v1827_v19, %v1855_v30  ;;  %2335 = vst [vmem:[#allocation9_spill] sm:$0xff] %v1890_v44  ;;  %v1897_v47 = vand.u32 4294901760, %v268_v40  ;;  %v471_v50 = vsub.f32 %v1843_v25, %v1876_v38  ;;  %v1907_v51 = vand.u32 4294901760, %v1880_v39 }
  0x18   :  { %v444_v34 = vand.u32 4294901760, %v443_v28  ;;  %1420 = vmatprep.subr.mxu0 %v1809_v8  ;;  %v451_v41 = vand.u32 4294901760, %v450_v29  ;;  %v458_v49 = vand.u32 4294901760, %v457_v37  ;;  %v1912_v53 = vsub.f32 %v269_v33, %v1883_v42  ;;  %v262_v29 = vld [vmem:[#allocation3] sm:$0xff] }
  0x19   :  { %1691 = vset.pattern.permute.xlu1 %v1769_v27  ;;  %1692 = vset.pattern.permute.xlu0 %v1769_v27  ;;  %2336 = vst [vmem:[#allocation10_spill] sm:$0xff] %v1907_v51  ;;  %v1914_v54 = vand.u32 4294901760, %v267_v46  ;;  %v465_v55 = vand.u32 4294901760, %v464_v43  ;;  %v478_v56 = vsub.f32 %v1858_v31, %v1890_v44  ;;  %v1919_v57 = vand.u32 4294901760, %v1893_v45 }
  0x1a   :  { %147 = vperm.xlu1 %1691, %v41_v2   ;;  %151 = vperm.xlu0 %1692, %v42_v1   ;;  %v1925_v59 = vsub.f32 %v268_v40, %v1897_v47  ;;  %v1927_v60 = vand.u32 4294901760, %v266_v52  ;;  %v472_v62 = vand.u32 4294901760, %v471_v50  ;;  %v485_v63 = vsub.f32 %v1880_v39, %v1907_v51  ;;  %v264_v1 = vld [vmem:[#allocation3 + $0x10] sm:$0xff] }
  0x1b   :  { %1460 = vmatprep.subr.mxu1 %v444_v34  ;;  %1421 = vmatpush3.msra.mxu0 %v1809_v8  ;;  %2337 = vst [vmem:[#allocation11_spill] sm:$0xff] %v1919_v57  ;;  %v1938_v2 = vand.u32 4294901760, %v1912_v53  ;;  %v1942_v3 = vsub.f32 %v267_v46, %v1914_v54  ;;  %v1944_v4 = vand.u32 4294901760, %v265_v58  ;;  %v479_v5 = vand.u32 4294901760, %v478_v56 }
  0x1c   :  { %1461 = vmatpush3.msra.mxu1 %v444_v34  ;;  %1422 = vmatprep.subr.mxu0 %v1813_v13  ;;  %v492_v9 = vsub.f32 %v1893_v45, %v1919_v57  ;;  %v1951_v11 = vand.u32 4294901760, %v1925_v59  ;;  %v1954_v18 = vsub.f32 %v266_v52, %v1927_v60  ;;  %v1956_v23 = vand.u32 4294901760, %v264_v1 }
  0x1d   :  { %1462 = vmatprep.subr.mxu1 %v451_v41  ;;  %1423 = vmatpush3.msra.mxu0 %v1813_v13  ;;  %2338 = vst [vmem:[#allocation12_spill] sm:$0xff] %v1938_v2  ;;  %v486_v28 = vand.u32 4294901760, %v485_v63  ;;  %v499_v33 = vsub.f32 %v1912_v53, %v1938_v2  ;;  %v1963_v34 = vand.u32 4294901760, %v1942_v3  ;;  %v1966_v37 = vsub.f32 %v265_v58, %v1944_v4 }
  0x1e   :  { %1693 = vset.pattern.permute.xlu1 %v1767_v0  ;;  %1695 = vset.pattern.permute.xlu0 %v1767_v0  ;;  %2339 = vst [vmem:[#allocation13_spill] sm:$0xff] %v1951_v11  ;;  %v1968_v40 = vand.u32 4294901760, %v263_v10  ;;  %v506_v43 = vsub.f32 %v1925_v59, %v1951_v11  ;;  %v1975_v46 = vand.u32 4294901760, %v1954_v18  ;;  %v1980_v50 = vand.u32 4294901760, %v262_v29 }
  0x1f   :  { %62 = vperm.xlu1 %1693, %v1866_v35   ;;  %67 = vperm.xlu0 %1695, %v1871_v36   ;;  %2340 = vst [vmem:[#allocation14_spill] sm:$0xff] %v1963_v34  ;;  %v500_v52 = vand.u32 4294901760, %v499_v33  ;;  %v1988_v56 = vand.u32 4294901760, %v1966_v37 }
  0x20   :  { %1463 = vmatpush3.msra.mxu1 %v451_v41  ;;  %1424 = vmatprep.subr.mxu0 %v1815_v14  ;;  %v493_v41 = vand.u32 4294901760, %v492_v9  ;;  %2341 = vst [vmem:[#allocation15_spill] sm:$0xff] %v1975_v46  ;;  %v1991_v58 = vsub.f32 %v263_v10, %v1968_v40 }
  0x21   :  { %1464 = vmatprep.subr.mxu1 %v458_v49  ;;  %1425 = vmatpush3.msra.mxu0 %v1815_v14  ;;  %2342 = vst [vmem:[#allocation16_spill] sm:$0xff] %v1988_v56  ;;  %v527_v9 = vsub.f32 %v1966_v37, %v1988_v56 }
  0x22   :  { %1465 = vmatpush3.msra.mxu1 %v458_v49  ;;  %1426 = vmatprep.subr.mxu0 %v1830_v20  ;;  %v1978_v49 = vsub.f32 %v264_v1, %v1956_v23  ;;  %v2004_v1 = vsub.f32 %v262_v29, %v1980_v50  ;;  %v2011_v10 = vand.u32 4294901760, %v1991_v58 }
  0x23   :  { %1694 = vset.pattern.permute.xlu1 %v1768_v12  ;;  %77 = vperm.xlu0 %1695, %v1902_v48  }
  0x24   :  { %111 = vperm.xlu1 %1694, %v1866_v35   ;;  %1466 = vmatprep.subr.mxu1 %v465_v55  ;;  %v2001_v63 = vand.u32 4294901760, %v1978_v49  ;;  %2344 = vst [vmem:[#allocation18_spill] sm:$0xff] %v2011_v10  ;;  %v2017_v33 = vand.u32 4294901760, %v2004_v1 }
  0x25   :  { %1467 = vmatpush3.msra.mxu1 %v465_v55  ;;  %1427 = vmatpush3.msra.mxu0 %v1830_v20  ;;  %v513_v55 = vsub.f32 %v1942_v3, %v1963_v34 }
  0x26   :  { %1468 = vmatprep.subr.mxu1 %v472_v62  ;;  %1428 = vmatprep.subr.mxu0 %v1846_v26  ;;  %2343 = vst [vmem:[#allocation17_spill] sm:$0xff] %v2001_v63  ;;  %v534_v29 = vsub.f32 %v1978_v49, %v2001_v63  ;;  %2345 = vst [vmem:[#allocation19_spill] sm:$0xff] %v2017_v33 }
  0x27   :  { %87 = vperm.xlu0 %1695, %v1933_v61   ;;  %1469 = vmatpush3.msra.mxu1 %v472_v62  ;;  %v520_v62 = vsub.f32 %v1954_v18, %v1975_v46 }
  0x28   :  { %115 = vperm.xlu1 %1694, %v1871_v36   ;;  %1470 = vmatprep.subr.mxu1 %v479_v5 }
  0x29   :  { %1471 = vmatpush3.msra.mxu1 %v479_v5  ;;  %1429 = vmatpush3.msra.mxu0 %v1846_v26  ;;  %v514_v5 = vand.u32 4294901760, %v513_v55  ;;  %v548_v55 = vsub.f32 %v2004_v1, %v2017_v33 }
  0x2a   :  { %1472 = vmatprep.subr.mxu1 %v486_v28  ;;  %1430 = vmatprep.subr.mxu0 %v1860_v32 }
  0x2b   :  { %1702 = vset.pattern.permute.xlu0 %v1769_v27  ;;  %1473 = vmatpush3.msra.mxu1 %v486_v28  ;;  %v521_v28 = vand.u32 4294901760, %v520_v62  ;;  %v549_v62 = vand.u32 4294901760, %v548_v55 }
  0x2c   :  { %1696 = vset.pattern.permute.xlu1 %v1769_v27  ;;  %159 = vperm.xlu0 %1702, %v1871_v36   ;;  %v45_v36 = vld [vmem:[%s2309_s0 + $0x20] sm:$0xff] }
  0x2d   :  { %155 = vperm.xlu1 %1696, %v1866_v35   ;;  %1474 = vmatprep.subr.mxu1 %v493_v41  ;;  %v507_v35 = vand.u32 4294901760, %v506_v43  ;;  %v541_v43 = vsub.f32 %v1991_v58, %v2011_v10 }
  0x2e   :  { %1475 = vmatpush3.msra.mxu1 %v493_v41  ;;  %1431 = vmatpush3.msra.mxu0 %v1860_v32  ;;  %v528_v41 = vand.u32 4294901760, %v527_v9  ;;  %v49_v9 = vld [vmem:[%s2310_s1] sm:$0x7]  ;;  %s1770_s1 = smov [#allocation6]  }
  0x2f   :  { %1476 = vmatprep.subr.mxu1 %v500_v52  ;;  %1432 = vmatprep.subr.mxu0 %v1883_v42  ;;  %s1260_s8 = sshll.u32 %s1770_s1, 4  ;;  %s1261_s8 = int_to_ptr.vmem [resolvable:$true] %s1260_s8 }
  0x30   :  { %167 = vperm.xlu0 %1702, %v1902_v48   ;;  %1477 = vmatpush3.msra.mxu1 %v500_v52  ;;  %v535_v52 = vand.u32 4294901760, %v534_v29  ;;  %s1740_s9 = scalar_lea.vmem %s1261_s8, 1024  ;;  %p1745_p6 = scmp.lt.s32.totalorder %s1261_s8, %s1261_s8 }
  0x31   :  { %1697 = vset.pattern.permute.xlu1 %v1767_v0  ;;  %1478 = vmatprep.subr.mxu1 %v507_v35  ;;  %p1741_p5 = scmp.ne.s32.totalorder %s1261_s8, %s1740_s9  ;;  %p1746_p7 = scmp.lt.s32.totalorder %s1740_s9, %s1740_s9 }
  0x32   :  { %72 = vperm.xlu1 %1697, %v45_v36   ;;  %1479 = vmatpush3.msra.mxu1 %v507_v35  ;;  %v542_v35 = vand.u32 4294901760, %v541_v43 }
  0x33   :  { %1480 = vmatprep.subr.mxu1 %v514_v5  ;;  %1433 = vmatpush3.msra.mxu0 %v1883_v42  ;;  %p1747_p8 = por %p1746_p7, %p1745_p6 }
  0x34   :  { %175 = vperm.xlu0 %1702, %v1933_v61   ;;  %1481 = vmatpush3.msra.mxu1 %v514_v5 }
  0x35   :  { %1482 = vmatprep.subr.mxu1 %v521_v28  ;;  %1434 = vmatprep.subr.mxu0 %v1897_v47  ;;  %p1748_p9 = pnand %p1747_p8, %p1741_p5 }
  0x36   :  { %1698 = vset.pattern.permute.xlu1 %v1768_v12  ;;  %1483 = vmatpush3.msra.mxu1 %v521_v28 }
  0x37   :  { %119 = vperm.xlu1 %1698, %v45_v36   ;;  %1484 = vmatprep.subr.mxu1 %v528_v41 }
  0x38   :  { %1485 = vmatpush3.msra.mxu1 %v528_v41  ;;  %1435 = vmatpush3.msra.mxu0 %v1897_v47 }
  0x39   :  { %1486 = vmatprep.subr.mxu1 %v535_v52  ;;  %1436 = vmatprep.subr.mxu0 %v1914_v54 }
  0x3a   :  { %1487 = vmatpush3.msra.mxu1 %v535_v52  ;;  %1437 = vmatpush3.msra.mxu0 %v1914_v54 }
  0x3b   :  { %123 = vperm.xlu1 %1698, %v1902_v48   ;;  %1488 = vmatprep.subr.mxu1 %v542_v35  ;;  %v47_v48 = vld [vmem:[%s2309_s0 + $0x30] sm:$0xff] }
  0x3c   :  { %1489 = vmatpush3.msra.mxu1 %v542_v35  ;;  %1438 = vmatprep.subr.mxu0 %v1927_v60 }
  0x3d   :  { %1490 = vmatprep.subr.mxu1 %v549_v62  ;;  %1439 = vmatpush3.msra.mxu0 %v1927_v60 }
  0x3e   :  { %1491 = vmatpush3.msra.mxu1 %v549_v62  ;;  %1440 = vmatprep.subr.mxu0 %v1944_v4 }
  0x3f   :  { %1699 = vset.pattern.permute.xlu1 %v1769_v27  ;;  %1441 = vmatpush3.msra.mxu0 %v1944_v4 }
  0x40   :  { %163 = vperm.xlu1 %1699, %v45_v36   ;;  %1548 = vmatprep.subr.mxu1 %v1805_v6 }
  0x41   :  { %1442 = vmatprep.subr.mxu0 %v1956_v23 }
  0x42   :  { %1443 = vmatpush3.msra.mxu0 %v1956_v23 }
  0x43   :  { %1444 = vmatprep.subr.mxu0 %v1968_v40 }
  0x44   :  { %1700 = vset.pattern.permute.xlu1 %v1767_v0  ;;  %1445 = vmatpush3.msra.mxu0 %v1968_v40  ;;  %v90_v0 = vlaneseq }
  0x45   :  { %82 = vperm.xlu1 %1700, %v47_v48   ;;  %1446 = vmatprep.subr.mxu0 %v1980_v50 }
  0x46   :  { %1447 = vmatpush3.msra.mxu0 %v1980_v50  ;;  %v91_v36 = vshrl.u32 %v90_v0, 7 }
  0x47   :  { %1504 = vmatprep.subr.mxu0 %v1818_v15 }
  0x48   :  { %v92_v5 = vsub.s32 0, %v91_v36  ;;  %v136_v28 = vsub.s32 1, %v91_v36 }
  0x49   :  { %1701 = vset.pattern.permute.xlu1 %v1768_v12 }
  0x4a   :  { %127 = vperm.xlu1 %1701, %v47_v48   ;;  %v2055_v43 = vrot.slane %v49_v9, %v92_v5  ;;  %v2057_v12 = vrot.slane %v49_v9, %v136_v28 }
  0x4e   :  { %131 = vperm.xlu1 %1701, %v1933_v61   ;;  %v180_v61 = vsub.s32 2, %v91_v36 }
  0x50   :  { %v2063_v33 = vrot.slane %v49_v9, %v180_v61 }
  0x52   :  { %1703 = vset.pattern.permute.xlu1 %v1769_v27 }
  0x53   :  { %171 = vperm.xlu1 %1703, %v47_v48  }
  0x8b   :  { %v58_v29 = vpop.permute.xlu1 %57  ;;  %v53_v41 = vpop.permute.xlu0 %52 }
  0x8c   :  { %v94_v52 = vsub.f32 %v53_v41, %v2055_v43  ;;  %v95_v48 = vsub.f32 %v58_v29, %v2055_v43 }
  0x8e   :  { %v190_v0 = vmul.f32 %v94_v52, %v94_v52  ;;  %v191_v28 = vmul.f32 %v95_v48, %v95_v48 }
  0x90   :  { %v108_v55 = vpop.permute.xlu1 %107  ;;  %v104_v27 = vpop.permute.xlu0 %103 }
  0x91   :  { %v139_v35 = vsub.f32 %v108_v55, %v2057_v12  ;;  %v138_v62 = vsub.f32 %v104_v27, %v2057_v12 }
  0x93   :  { %v198_v10 = vmul.f32 %v138_v62, %v138_v62  ;;  %v199_v63 = vmul.f32 %v139_v35, %v139_v35 }
  0x95   :  { %v148_v5 = vpop.permute.xlu1 %147  ;;  %v152_v56 = vpop.permute.xlu0 %151  ;;  %v206_v46 = vadd.f32 %v198_v10, %v190_v0  ;;  %v207_v34 = vadd.f32 %v199_v63, %v191_v28 }
  0x96   :  { %v182_v41 = vsub.f32 %v148_v5, %v2063_v33  ;;  %v183_v36 = vsub.f32 %v152_v56, %v2063_v33 }
  0x98   :  { %v214_v11 = vmul.f32 %v182_v41, %v182_v41  ;;  %v215_v55 = vmul.f32 %v183_v36, %v183_v36 }
  0x9a   :  { %v222_v2 = vadd.f32 %v214_v11, %v206_v46  ;;  %v223_v27 = vadd.f32 %v215_v55, %v207_v34  ;;  %v63_v57 = vpop.permute.xlu1 %62  ;;  %v68_v29 = vpop.permute.xlu0 %67 }
  0x9b   :  { %v97_v10 = vsub.f32 %v68_v29, %v2055_v43  ;;  %v96_v34 = vsub.f32 %v63_v57, %v2055_v43 }
  0x9c   :  { %v230_v52 = vsub.f32 0.0, %v222_v2  ;;  %v231_v9 = vsub.f32 0.0, %v223_v27 }
  0x9d   :  { %v193_v46 = vmul.f32 %v97_v10, %v97_v10  ;;  %v192_v36 = vmul.f32 %v96_v34, %v96_v34 }
  0x9e   :  { %v238_v61 = vmul.f32 1.442695, %v230_v52  ;;  %v240_v62 = vmul.f32 1.442695, %v231_v9  ;;  %v78_v35 = vpop.permute.xlu0 %77 }
  0x9f   :  { %v112_v51 = vpop.permute.xlu1 %111 }
  0xa0   :  { %1704 = vpow2.f32 %v238_v61  ;;  %v140_v56 = vsub.f32 %v112_v51, %v2057_v12 }
  0xa1   :  { %1706 = vpow2.f32 %v240_v62 }
  0xa2   :  { %v2068_v48 = vpop.permute.xlu0 %87  ;;  %v200_v0 = vmul.f32 %v140_v56, %v140_v56 }
  0xa3   :  { %v116_v63 = vpop.permute.xlu1 %115 }
  0xa4   :  { %v141_v11 = vsub.f32 %v116_v63, %v2057_v12  ;;  %v208_v52 = vadd.f32 %v200_v0, %v192_v36  ;;  %v99_v36 = vsub.f32 %v78_v35, %v2055_v43 }
  0xa6   :  { %v201_v2 = vmul.f32 %v141_v11, %v141_v11 }
  0xa7   :  { %v160_v5 = vpop.permute.xlu0 %159 }
  0xa8   :  { %v185_v28 = vsub.f32 %v160_v5, %v2063_v33  ;;  %v156_v41 = vpop.permute.xlu1 %155  ;;  %v209_v27 = vadd.f32 %v201_v2, %v193_v46 }
  0xa9   :  { %v184_v55 = vsub.f32 %v156_v41, %v2063_v33 }
  0xaa   :  { %v217_v29 = vmul.f32 %v185_v28, %v185_v28 }
  0xab   :  { %v216_v9 = vmul.f32 %v184_v55, %v184_v55  ;;  %v168_v41 = vpop.permute.xlu0 %167 }
  0xac   :  { %v225_v51 = vadd.f32 %v217_v29, %v209_v27 }
  0xad   :  { %v1705_v61 = vpop.eup %1704  ;;  %v224_v62 = vadd.f32 %v216_v9, %v208_v52  ;;  %v73_v63 = vpop.permute.xlu1 %72 }
  0xae   :  { %v1707_v44 = vpop.eup %1706  ;;  %v233_v57 = vsub.f32 0.0, %v225_v51  ;;  %v2075_v10 = vand.u32 4294901760, %v1705_v61  ;;  %v195_v51 = vmul.f32 %v99_v36, %v99_v36 }
  0xaf   :  { %v232_v56 = vsub.f32 0.0, %v224_v62  ;;  %v2077_v11 = vand.u32 4294901760, %v1707_v44 }
  0xb0   :  { %v244_v5 = vmul.f32 1.442695, %v233_v57  ;;  %1492 = vmatprep.mubr.f32.mxu1 %v2075_v10  ;;  %v2081_v34 = vsub.f32 %v1705_v61, %v2075_v10  ;;  %v98_v57 = vsub.f32 %v73_v63, %v2055_v43 }
  0xb1   :  { %v242_v46 = vmul.f32 1.442695, %v232_v56  ;;  %1493 = vmatmul.mubr.f32.vlgmr.msra.gmra.mxu1 %v2077_v11  ;;  %v2085_v2 = vsub.f32 %v1707_v44, %v2077_v11  ;;  %v187_v44 = vsub.f32 %v168_v41, %v2063_v33 }
  0xb2   :  { %1708 = vpow2.f32 %v244_v5  ;;  %v120_v0 = vpop.permute.xlu1 %119  ;;  %v361_v28 = vand.u32 4294901760, %v2081_v34  ;;  %1549 = vmatpush3.msra.mxu1 %v1805_v6  ;;  %v194_v63 = vmul.f32 %v98_v57, %v98_v57 }
  0xb3   :  { %1710 = vpow2.f32 %v242_v46  ;;  %v371_v55 = vand.u32 4294901760, %v2085_v2  ;;  %1550 = vmatprep.subr.mxu1 %v1807_v7  ;;  %v142_v35 = vsub.f32 %v120_v0, %v2057_v12  ;;  %v219_v5 = vmul.f32 %v187_v44, %v187_v44 }
  0xb4   :  { %v362_v27 = vsub.f32 %v2081_v34, %v361_v28  ;;  %1551 = vmatpush3.msra.mxu1 %v1807_v7 }
  0xb5   :  { %v372_v29 = vsub.f32 %v2085_v2, %v371_v55  ;;  %1552 = vmatprep.subr.mxu1 %v1809_v8  ;;  %v202_v46 = vmul.f32 %v142_v35, %v142_v35 }
  0xb6   :  { %v124_v52 = vpop.permute.xlu1 %123  ;;  %v363_v9 = vand.u32 4294901760, %v362_v27  ;;  %1553 = vmatpush3.msra.mxu1 %v1809_v8 }
  0xb7   :  { %v143_v61 = vsub.f32 %v124_v52, %v2057_v12  ;;  %v373_v62 = vand.u32 4294901760, %v372_v29  ;;  %1554 = vmatprep.subr.mxu1 %v1813_v13 }
  0xb8   :  { %1448 = vmatprep.mubr.f32.mxu0 %v363_v9  ;;  %1555 = vmatpush3.msra.mxu1 %v1813_v13 }
  0xb9   :  { %v203_v56 = vmul.f32 %v143_v61, %v143_v61  ;;  %1449 = vmatmul.mubr.f32.vlgmr.msra.gmra.mxu0 %v373_v62  ;;  %1556 = vmatprep.subr.mxu1 %v1815_v14 }
  0xba   :  { %1505 = vmatpush3.msra.mxu0 %v1818_v15  ;;  %1557 = vmatpush3.msra.mxu1 %v1815_v14  ;;  %v210_v15 = vadd.f32 %v202_v46, %v194_v63 }
  0xbb   :  { %v211_v0 = vadd.f32 %v203_v56, %v195_v51  ;;  %v164_v41 = vpop.permute.xlu1 %163  ;;  %1506 = vmatprep.subr.mxu0 %v1821_v16  ;;  %1558 = vmatprep.subr.mxu1 %v1830_v20 }
  0xbc   :  { %v186_v36 = vsub.f32 %v164_v41, %v2063_v33  ;;  %1507 = vmatpush3.msra.mxu0 %v1821_v16  ;;  %1559 = vmatpush3.msra.mxu1 %v1830_v20  ;;  %v176_v41 = vpop.permute.xlu0 %175 }
  0xbd   :  { %v227_v27 = vadd.f32 %v219_v5, %v211_v0  ;;  %1508 = vmatprep.subr.mxu0 %v1824_v17  ;;  %1560 = vmatprep.subr.mxu1 %v1846_v26 }
  0xbe   :  { %v218_v44 = vmul.f32 %v186_v36, %v186_v36  ;;  %1509 = vmatpush3.msra.mxu0 %v1824_v17  ;;  %1561 = vmatpush3.msra.mxu1 %v1846_v26 }
  0xbf   :  { %v1709_v29 = vpop.eup %1708  ;;  %v235_v35 = vsub.f32 0.0, %v227_v27  ;;  %1510 = vmatprep.subr.mxu0 %v1827_v19  ;;  %1562 = vmatprep.subr.mxu1 %v1860_v32 }
  0xc0   :  { %v1711_v16 = vpop.eup %1710  ;;  %v226_v52 = vadd.f32 %v218_v44, %v210_v15  ;;  %v83_v9 = vpop.permute.xlu1 %82  ;;  %v2121_v51 = vand.u32 4294901760, %v1709_v29  ;;  %1511 = vmatpush3.msra.mxu0 %v1827_v19  ;;  %1563 = vmatpush3.msra.mxu1 %v1860_v32  ;;  %v189_v44 = vsub.f32 %v176_v41, %v2063_v33 }
  0xc1   :  { %v248_v61 = vmul.f32 1.442695, %v235_v35  ;;  %v2125_v62 = vand.u32 4294901760, %v1711_v16  ;;  %1512 = vmatprep.subr.mxu0 %v1843_v25  ;;  %1564 = vmatprep.subr.mxu1 %v1883_v42 }
  0xc2   :  { %v234_v17 = vsub.f32 0.0, %v226_v52  ;;  %v2130_v57 = vsub.f32 %v1709_v29, %v2121_v51  ;;  %1513 = vmatpush3.msra.mxu0 %v1843_v25  ;;  %1565 = vmatpush3.msra.mxu1 %v1883_v42 }
  0xc3   :  { %1712 = vpow2.f32 %v248_v61  ;;  %1495 = vmatprep.mubr.f32.mxu1 %v2125_v62  ;;  %v2136_v19 = vsub.f32 %v1711_v16, %v2125_v62  ;;  %1514 = vmatprep.subr.mxu0 %v1858_v31 }
  0xc4   :  { %v246_v56 = vmul.f32 1.442695, %v234_v17  ;;  %1496 = vmatmul.mubr.f32.gmra.mxu1 %v2121_v51  ;;  %v391_v5 = vand.u32 4294901760, %v2130_v57  ;;  %1566 = vmatprep.subr.mxu1 %v1897_v47 }
  0xc5   :  { %v128_v46 = vpop.permute.xlu1 %127  ;;  %v381_v25 = vand.u32 4294901760, %v2136_v19  ;;  %1515 = vmatpush3.msra.mxu0 %v1858_v31  ;;  %1567 = vmatpush3.msra.mxu1 %v1897_v47  ;;  %v101_v31 = vsub.f32 %v2068_v48, %v2055_v43  ;;  %v100_v48 = vsub.f32 %v83_v9, %v2055_v43 }
  0xc6   :  { %1714 = vpow2.f32 %v246_v56  ;;  %v392_v0 = vsub.f32 %v2130_v57, %v391_v5  ;;  %1516 = vmatprep.subr.mxu0 %v1880_v39  ;;  %1568 = vmatprep.subr.mxu1 %v1914_v54  ;;  %v144_v36 = vsub.f32 %v128_v46, %v2057_v12 }
  0xc7   :  { %v382_v63 = vsub.f32 %v2136_v19, %v381_v25  ;;  %1517 = vmatpush3.msra.mxu0 %v1880_v39  ;;  %1569 = vmatpush3.msra.mxu1 %v1914_v54  ;;  %v197_v35 = vmul.f32 %v101_v31, %v101_v31  ;;  %v196_v43 = vmul.f32 %v100_v48, %v100_v48 }
  0xc8   :  { %1518 = vmatprep.subr.mxu0 %v1893_v45  ;;  %1570 = vmatprep.subr.mxu1 %v1927_v60  ;;  %v393_v29 = vand.u32 4294901760, %v392_v0 }
  0xc9   :  { %v132_v27 = vpop.permute.xlu1 %131  ;;  %v383_v15 = vand.u32 4294901760, %v382_v63  ;;  %1519 = vmatpush3.msra.mxu0 %v1893_v45  ;;  %1571 = vmatpush3.msra.mxu1 %v1927_v60  ;;  %v204_v45 = vmul.f32 %v144_v36, %v144_v36 }
  0xca   :  { %v145_v39 = vsub.f32 %v132_v27, %v2057_v12  ;;  %1520 = vmatprep.subr.mxu0 %v1912_v53  ;;  %1572 = vmatprep.subr.mxu1 %v1944_v4  ;;  %v221_v12 = vmul.f32 %v189_v44, %v189_v44 }
  0xcb   :  { %1451 = vmatprep.mubr.f32.mxu0 %v383_v15  ;;  %1521 = vmatpush3.msra.mxu0 %v1912_v53  ;;  %v212_v56 = vadd.f32 %v204_v45, %v196_v43 }
  0xcc   :  { %v205_v16 = vmul.f32 %v145_v39, %v145_v39  ;;  %1452 = vmatmul.mubr.f32.gmra.mxu0 %v393_v29  ;;  %1573 = vmatpush3.msra.mxu1 %v1944_v4 }
  0xcd   :  { %1522 = vmatprep.subr.mxu0 %v1925_v59  ;;  %1574 = vmatprep.subr.mxu1 %v1956_v23 }
  0xce   :  { %v213_v52 = vadd.f32 %v205_v16, %v197_v35  ;;  %v172_v61 = vpop.permute.xlu1 %171  ;;  %1523 = vmatpush3.msra.mxu0 %v1925_v59  ;;  %1575 = vmatpush3.msra.mxu1 %v1956_v23 }
  0xcf   :  { %v188_v53 = vsub.f32 %v172_v61, %v2063_v33  ;;  %1524 = vmatprep.subr.mxu0 %v1942_v3  ;;  %1576 = vmatprep.subr.mxu1 %v1968_v40 }
  0xd0   :  { %v1713_v9 = vpop.eup %1712  ;;  %v229_v17 = vadd.f32 %v221_v12, %v213_v52  ;;  %1525 = vmatpush3.msra.mxu0 %v1942_v3  ;;  %1577 = vmatpush3.msra.mxu1 %v1968_v40 }
  0xd1   :  { %v220_v46 = vmul.f32 %v188_v53, %v188_v53  ;;  %v2178_v0 = vand.u32 4294901760, %v1713_v9  ;;  %1526 = vmatprep.subr.mxu0 %v1954_v18  ;;  %1578 = vmatprep.subr.mxu1 %v1980_v50 }
  0xd2   :  { %v237_v59 = vsub.f32 0.0, %v229_v17  ;;  %1527 = vmatpush3.msra.mxu0 %v1954_v18  ;;  %1579 = vmatpush3.msra.mxu1 %v1980_v50 }
  0xd3   :  { %v1715_v33 = vpop.eup %1714  ;;  %v228_v41 = vadd.f32 %v220_v46, %v212_v56  ;;  %v2185_v63 = vsub.f32 %v1713_v9, %v2178_v0  ;;  %1528 = vmatprep.subr.mxu0 %v1966_v37  ;;  %1636 = vmatprep.subr.mxu1 %v1805_v6 }
  0xd4   :  { %v252_v3 = vmul.f32 1.442695, %v237_v59  ;;  %v2189_v31 = vand.u32 4294901760, %v1715_v33  ;;  %1529 = vmatpush3.msra.mxu0 %v1966_v37 }
  0xd5   :  { %v236_v36 = vsub.f32 0.0, %v228_v41  ;;  %v411_v27 = vand.u32 4294901760, %v2185_v63  ;;  %1530 = vmatprep.subr.mxu0 %v1978_v49 }
  0xd6   :  { %1716 = vpow2.f32 %v252_v3  ;;  %1498 = vmatprep.mubr.f32.mxu1 %v2189_v31  ;;  %v400_v18 = vsub.f32 %v1715_v33, %v2189_v31  ;;  %1531 = vmatpush3.msra.mxu0 %v1978_v49 }
  0xd7   :  { %v250_v15 = vmul.f32 1.442695, %v236_v36  ;;  %1499 = vmatmul.mubr.f32.gmra.mxu1 %v2178_v0  ;;  %1532 = vmatprep.subr.mxu0 %v1991_v58  ;;  %v412_v37 = vsub.f32 %v2185_v63, %v411_v27 }
  0xd8   :  { %v401_v44 = vand.u32 4294901760, %v400_v18  ;;  %1533 = vmatpush3.msra.mxu0 %v1991_v58 }
  0xd9   :  { %1718 = vpow2.f32 %v250_v15  ;;  %1534 = vmatprep.subr.mxu0 %v2004_v1  ;;  %v413_v49 = vand.u32 4294901760, %v412_v37 }
  0xda   :  { %v402_v39 = vsub.f32 %v400_v18, %v401_v44  ;;  %1535 = vmatpush3.msra.mxu0 %v2004_v1 }
  0xdb   :  { %1592 = vmatprep.subr.mxu0 %v1833_v21 }
  0xdc   :  { %v403_v29 = vand.u32 4294901760, %v402_v39 }
  0xde   :  { %1454 = vmatprep.mubr.f32.mxu0 %v403_v29 }
  0xdf   :  { %1455 = vmatmul.mubr.f32.gmra.mxu0 %v413_v49 }
  0xe3   :  { %v1717_v48 = vpop.eup %1716 }
  0xe4   :  { %v2204_v35 = vand.u32 4294901760, %v1717_v48 }
  0xe6   :  { %v1719_v16 = vpop.eup %1718  ;;  %v430_v58 = vsub.f32 %v1717_v48, %v2204_v35 }
  0xe7   :  { %v2207_v45 = vand.u32 4294901760, %v1719_v16 }
  0xe8   :  { %v431_v12 = vand.u32 4294901760, %v430_v58 }
  0xe9   :  { %1501 = vmatprep.mubr.f32.mxu1 %v2207_v45  ;;  %v420_v52 = vsub.f32 %v1719_v16, %v2207_v45 }
  0xea   :  { %1502 = vmatmul.mubr.f32.gmra.mxu1 %v2204_v35  ;;  %v432_v61 = vsub.f32 %v430_v58, %v431_v12 }
  0xeb   :  { %1580 = vmatprep.mubr.f32.mxu1 %v361_v28  ;;  %v421_v1 = vand.u32 4294901760, %v420_v52 }
  0xec   :  { %v433_v9 = vand.u32 4294901760, %v432_v61 }
  0xed   :  { %v422_v43 = vsub.f32 %v420_v52, %v421_v1 }
  0xee   :  { %1581 = vmatmul.mubr.f32.vlgmr.msra.gmra.mxu1 %v371_v55 }
  0xef   :  { %1637 = vmatpush3.msra.mxu1 %v1805_v6  ;;  %1583 = vmatprep.mubr.f32.mxu1 %v381_v25  ;;  %v423_v53 = vand.u32 4294901760, %v422_v43  ;;  %v2346_v6 = vld [vmem:[#allocation9_spill] sm:$0xff] }
  0xf0   :  { %1638 = vmatprep.subr.mxu1 %v1807_v7 }
  0xf1   :  { %1639 = vmatpush3.msra.mxu1 %v1807_v7  ;;  %1457 = vmatprep.mubr.f32.mxu0 %v423_v53  ;;  %v2347_v7 = vld [vmem:[#allocation10_spill] sm:$0xff] }
  0xf2   :  { %1640 = vmatprep.subr.mxu1 %v1809_v8  ;;  %1458 = vmatmul.mubr.f32.gmra.mxu0 %v433_v9 }
  0xf3   :  { %1584 = vmatmul.mubr.f32.gmra.mxu1 %v391_v5  ;;  %1536 = vmatprep.mubr.f32.mxu0 %v2081_v34 }
  0xf4   :  { %1641 = vmatpush3.msra.mxu1 %v1809_v8  ;;  %1586 = vmatprep.mubr.f32.mxu1 %v401_v44  ;;  %v2348_v8 = vld [vmem:[#allocation11_spill] sm:$0xff] }
  0xf5   :  { %1642 = vmatprep.subr.mxu1 %v1813_v13 }
  0xf6   :  { %1643 = vmatpush3.msra.mxu1 %v1813_v13  ;;  %1537 = vmatmul.mubr.f32.vlgmr.msra.gmra.mxu0 %v2085_v2  ;;  %v2349_v13 = vld [vmem:[#allocation12_spill] sm:$0xff] }
  0xf7   :  { %1644 = vmatprep.subr.mxu1 %v1815_v14  ;;  %1587 = vmatmul.mubr.f32.gmra.mxu1 %v411_v27 }
  0xf8   :  { %1593 = vmatpush3.msra.mxu0 %v1833_v21  ;;  %1645 = vmatpush3.msra.mxu1 %v1815_v14  ;;  %v2350_v14 = vld [vmem:[#allocation13_spill] sm:$0xff]  ;;  %v2352_v21 = vld [vmem:[#allocation15_spill] sm:$0xff] }
  0xf9   :  { %1539 = vmatprep.mubr.f32.mxu0 %v2136_v19  ;;  %1589 = vmatprep.mubr.f32.mxu1 %v421_v1 }
  0xfa   :  { %1594 = vmatprep.subr.mxu0 %v1836_v22  ;;  %1646 = vmatprep.subr.mxu1 %v1830_v20 }
  0xfb   :  { %1595 = vmatpush3.msra.mxu0 %v1836_v22  ;;  %1647 = vmatpush3.msra.mxu1 %v1830_v20  ;;  %v2351_v20 = vld [vmem:[#allocation14_spill] sm:$0xff]  ;;  %v2353_v22 = vld [vmem:[#allocation16_spill] sm:$0xff] }
  0xfc   :  { %1596 = vmatprep.subr.mxu0 %v1840_v24  ;;  %1648 = vmatprep.subr.mxu1 %v1846_v26 }
  0xfd   :  { %1540 = vmatmul.mubr.f32.gmra.mxu0 %v2130_v57  ;;  %1590 = vmatmul.mubr.f32.gmra.mxu1 %v431_v12 }
  0xfe   :  { %1597 = vmatpush3.msra.mxu0 %v1840_v24  ;;  %1649 = vmatpush3.msra.mxu1 %v1846_v26  ;;  %v2354_v24 = vld [vmem:[#allocation17_spill] sm:$0xff]  ;;  %v2355_v26 = vld [vmem:[#allocation18_spill] sm:$0xff] }
  0xff   :  { %1542 = vmatprep.mubr.f32.mxu0 %v400_v18  ;;  %1598 = vmatprep.subr.mxu0 %v1855_v30 }
 0x100   :  { %1650 = vmatprep.subr.mxu1 %v1860_v32  ;;  %1668 = vmatprep.mubr.f32.mxu1 %v2075_v10 }
 0x101   :  { %1599 = vmatpush3.msra.mxu0 %v1855_v30  ;;  %1651 = vmatpush3.msra.mxu1 %v1860_v32  ;;  %v2356_v30 = vld [vmem:[#allocation19_spill] sm:$0xff] }
 0x102   :  { %1600 = vmatprep.subr.mxu0 %v1876_v38  ;;  %1652 = vmatprep.subr.mxu1 %v1883_v42 }
 0x103   :  { %1543 = vmatmul.mubr.f32.gmra.mxu0 %v2185_v63  ;;  %1653 = vmatpush3.msra.mxu1 %v1883_v42 }
 0x104   :  { %1601 = vmatpush3.msra.mxu0 %v1876_v38  ;;  %1545 = vmatprep.mubr.f32.mxu0 %v420_v52 }
 0x105   :  { %1602 = vmatprep.subr.mxu0 %v2346_v6  ;;  %1654 = vmatprep.subr.mxu1 %v1897_v47 }
 0x106   :  { %1603 = vmatpush3.msra.mxu0 %v2346_v6  ;;  %1655 = vmatpush3.msra.mxu1 %v1897_v47 }
 0x107   :  { %1604 = vmatprep.subr.mxu0 %v2347_v7  ;;  %1656 = vmatprep.subr.mxu1 %v1914_v54 }
 0x108   :  { %1546 = vmatmul.mubr.f32.gmra.mxu0 %v430_v58  ;;  %1657 = vmatpush3.msra.mxu1 %v1914_v54 }
 0x109   :  { %1605 = vmatpush3.msra.mxu0 %v2347_v7  ;;  %1624 = vmatprep.mubr.f32.mxu0 %v2075_v10 }
 0x10a   :  { %1606 = vmatprep.subr.mxu0 %v2348_v8  ;;  %1658 = vmatprep.subr.mxu1 %v1927_v60 }
 0x10b   :  { %1607 = vmatpush3.msra.mxu0 %v2348_v8  ;;  %1659 = vmatpush3.msra.mxu1 %v1927_v60 }
 0x10c   :  { %1608 = vmatprep.subr.mxu0 %v2349_v13  ;;  %1660 = vmatprep.subr.mxu1 %v1944_v4 }
 0x10d   :  { %1609 = vmatpush3.msra.mxu0 %v2349_v13  ;;  %1661 = vmatpush3.msra.mxu1 %v1944_v4 }
 0x10e   :  { %1610 = vmatprep.subr.mxu0 %v2350_v14  ;;  %1662 = vmatprep.subr.mxu1 %v1956_v23 }
 0x10f   :  { %1611 = vmatpush3.msra.mxu0 %v2350_v14  ;;  %1663 = vmatpush3.msra.mxu1 %v1956_v23 }
 0x110   :  { %1612 = vmatprep.subr.mxu0 %v2351_v20  ;;  %1664 = vmatprep.subr.mxu1 %v1968_v40 }
 0x111   :  { %1613 = vmatpush3.msra.mxu0 %v2351_v20  ;;  %1665 = vmatpush3.msra.mxu1 %v1968_v40 }
 0x112   :  { %1614 = vmatprep.subr.mxu0 %v2352_v21  ;;  %1666 = vmatprep.subr.mxu1 %v1980_v50 }
 0x113   :  { %1615 = vmatpush3.msra.mxu0 %v2352_v21  ;;  %1667 = vmatpush3.msra.mxu1 %v1980_v50 }
 0x114   :  { %1616 = vmatprep.subr.mxu0 %v2353_v22  ;;  %1669 = vmatmul.mubr.f32.vlgmr.msra.gmra.mxu1 %v2077_v11 }
 0x115   :  { %1617 = vmatpush3.msra.mxu0 %v2353_v22  ;;  %1671 = vmatprep.mubr.f32.mxu1 %v2125_v62 }
 0x116   :  { %1618 = vmatprep.subr.mxu0 %v2354_v24 }
 0x117   :  { %1619 = vmatpush3.msra.mxu0 %v2354_v24 }
 0x118   :  { %1620 = vmatprep.subr.mxu0 %v2355_v26  ;;  %1672 = vmatmul.mubr.f32.gmra.mxu1 %v2121_v51 }
 0x119   :  { %1621 = vmatpush3.msra.mxu0 %v2355_v26  ;;  %1674 = vmatprep.mubr.f32.mxu1 %v2189_v31 }
 0x11a   :  { %1622 = vmatprep.subr.mxu0 %v2356_v30 }
 0x11b   :  { %1623 = vmatpush3.msra.mxu0 %v2356_v30 }
 0x11c   :  { %1625 = vmatmul.mubr.f32.vlgmr.msra.gmra.mxu0 %v2077_v11  ;;  %1675 = vmatmul.mubr.f32.gmra.mxu1 %v2178_v0 }
 0x11d   :  { %1627 = vmatprep.mubr.f32.mxu0 %v2125_v62  ;;  %1677 = vmatprep.mubr.f32.mxu1 %v2207_v45 }
 0x120   :  { %1628 = vmatmul.mubr.f32.gmra.mxu0 %v2121_v51  ;;  %1678 = vmatmul.mubr.f32.gmra.mxu1 %v2204_v35 }
 0x121   :  { %1630 = vmatprep.mubr.f32.mxu0 %v2189_v31 }
 0x124   :  { %1631 = vmatmul.mubr.f32.gmra.mxu0 %v2178_v0 }
 0x125   :  { %1633 = vmatprep.mubr.f32.mxu0 %v2207_v45 }
 0x128   :  { %1634 = vmatmul.mubr.f32.gmra.mxu0 %v2204_v35 }
 0x171   :  { %v1494_v32 = vpop.f32.mrf.mxu1 }
 0x173   :  { %v586_v38 = vpop.f32.mrf.mxu1 }
 0x179   :  { %v1450_v47 = vpop.f32.mrf.mxu0 }
 0x17a   :  { %v593_v31 = vadd.f32 %v1494_v32, %v1450_v47 }
 0x17b   :  { %v365_v60 = vpop.f32.mrf.mxu0 }
 0x17c   :  { %v587_v18 = vadd.f32 %v586_v38, %v365_v60 }
 0x184   :  { %v1497_v42 = vpop.f32.mrf.mxu1 }
 0x186   :  { %v598_v54 = vpop.f32.mrf.mxu1 }
 0x18c   :  { %v1453_v23 = vpop.f32.mrf.mxu0 }
 0x18d   :  { %v605_v37 = vadd.f32 %v1497_v42, %v1453_v23 }
 0x18e   :  { %v385_v50 = vpop.f32.mrf.mxu0 }
 0x18f   :  { %v599_v49 = vadd.f32 %v598_v54, %v385_v50 }
 0x197   :  { %v1500_v4 = vpop.f32.mrf.mxu1 }
 0x199   :  { %v610_v40 = vpop.f32.mrf.mxu1 }
 0x19f   :  { %v1456_v11 = vpop.f32.mrf.mxu0 }
 0x1a0   :  { %v617_v45 = vadd.f32 %v1500_v4, %v1456_v11 }
 0x1a1   :  { %v405_v2 = vpop.f32.mrf.mxu0 }
 0x1a2   :  { %v611_v61 = vadd.f32 %v610_v40, %v405_v2 }
 0x1aa   :  { %v1503_v10 = vpop.f32.mrf.mxu1 }
 0x1ac   :  { %v622_v34 = vpop.f32.mrf.mxu1 }
 0x1ae   :  { %v1582_v28 = vpop.f32.mrf.mxu1 }
 0x1b0   :  { %v870_v51 = vpop.f32.mrf.mxu1 }
 0x1b2   :  { %v1459_v55 = vpop.f32.mrf.mxu0 }
 0x1b3   :  { %v1585_v57 = vpop.f32.mrf.mxu1  ;;  %v629_v8 = vadd.f32 %v1503_v10, %v1459_v55 }
 0x1b4   :  { %v425_v62 = vpop.f32.mrf.mxu0 }
 0x1b5   :  { %v886_v5 = vpop.f32.mrf.mxu1  ;;  %v623_v26 = vadd.f32 %v622_v34, %v425_v62 }
 0x1b6   :  { %v1538_v19 = vpop.f32.mrf.mxu0 }
 0x1b7   :  { %v1588_v17 = vpop.f32.mrf.mxu1  ;;  %v740_v15 = vadd.f32 %v1538_v19, %v593_v31 }
 0x1b8   :  { %v732_v25 = vpop.f32.mrf.mxu0 }
 0x1b9   :  { %v902_v46 = vpop.f32.mrf.mxu1  ;;  %v733_v39 = vadd.f32 %v732_v25, %v587_v18  ;;  %v879_v35 = vadd.f32 %v1582_v28, %v740_v15 }
 0x1bb   :  { %v871_v1 = vadd.f32 %v870_v51, %v733_v39 }
 0x1bd   :  { %v1541_v56 = vpop.f32.mrf.mxu0  ;;  %v1591_v59 = vpop.f32.mrf.mxu1 }
 0x1be   :  { %v754_v48 = vadd.f32 %v1541_v56, %v605_v37 }
 0x1bf   :  { %v746_v0 = vpop.f32.mrf.mxu0  ;;  %v918_v41 = vpop.f32.mrf.mxu1 }
 0x1c0   :  { %v747_v12 = vadd.f32 %v746_v0, %v599_v49  ;;  %v895_v7 = vadd.f32 %v1585_v57, %v754_v48 }
 0x1c2   :  { %v887_v24 = vadd.f32 %v886_v5, %v747_v12 }
 0x1c3   :  { %v1544_v33 = vpop.f32.mrf.mxu0 }
 0x1c4   :  { %v768_v53 = vadd.f32 %v1544_v33, %v617_v45 }
 0x1c5   :  { %v760_v63 = vpop.f32.mrf.mxu0 }
 0x1c6   :  { %v761_v20 = vadd.f32 %v760_v63, %v611_v61  ;;  %v911_v47 = vadd.f32 %v1588_v17, %v768_v53 }
 0x1c8   :  { %v1547_v36 = vpop.f32.mrf.mxu0  ;;  %v903_v50 = vadd.f32 %v902_v46, %v761_v20 }
 0x1c9   :  { %v782_v32 = vadd.f32 %v1547_v36, %v629_v8 }
 0x1ca   :  { %v774_v29 = vpop.f32.mrf.mxu0 }
 0x1cb   :  { %v775_v4 = vadd.f32 %v774_v29, %v623_v26  ;;  %v927_v28 = vadd.f32 %v1591_v59, %v782_v32 }
 0x1cd   :  { %v919_v57 = vadd.f32 %v918_v41, %v775_v4 }
 0x1d4   :  { %v1670_v3 = vpop.f32.mrf.mxu1 }
 0x1d6   :  { %v1174_v27 = vpop.f32.mrf.mxu1 }
 0x1d8   :  { %v1673_v44 = vpop.f32.mrf.mxu1 }
 0x1da   :  { %v1186_v16 = vpop.f32.mrf.mxu1 }
 0x1dc   :  { %v1626_v58 = vpop.f32.mrf.mxu0  ;;  %v1676_v13 = vpop.f32.mrf.mxu1 }
 0x1dd   :  { %v1052_v52 = vadd.f32 %v1626_v58, %v879_v35 }
 0x1de   :  { %v1045_v43 = vpop.f32.mrf.mxu0  ;;  %v1198_v54 = vpop.f32.mrf.mxu1 }
 0x1df   :  { %v1181_v9 = vadd.f32 %v1670_v3, %v1052_v52  ;;  %v1046_v6 = vadd.f32 %v1045_v43, %v871_v1 }
 0x1e0   :  { %v1629_v14 = vpop.f32.mrf.mxu0  ;;  %v1679_v55 = vpop.f32.mrf.mxu1 }
 0x1e1   :  { %1248 = vst [vmem:[#allocation6 + $0x8] sm:$0xff] %v1181_v9  ;;  %v1175_v21 = vadd.f32 %v1174_v27, %v1046_v6  ;;  %v1064_v22 = vadd.f32 %v1629_v14, %v895_v7 }
 0x1e2   :  { %v1057_v30 = vpop.f32.mrf.mxu0  ;;  %v1210_v17 = vpop.f32.mrf.mxu1 }
 0x1e3   :  { %1247 = vst [vmem:[#allocation6] sm:$0xff] %v1175_v21  ;;  %v1193_v38 = vadd.f32 %v1673_v44, %v1064_v22  ;;  %v1058_v42 = vadd.f32 %v1057_v30, %v887_v24 }
 0x1e4   :  { %v1632_v60 = vpop.f32.mrf.mxu0 }
 0x1e5   :  { %1250 = vst [vmem:[#allocation6 + $0x18] sm:$0xff] %v1193_v38  ;;  %v1187_v23 = vadd.f32 %v1186_v16, %v1058_v42  ;;  %v1076_v40 = vadd.f32 %v1632_v60, %v911_v47 }
 0x1e6   :  { %v1069_v10 = vpop.f32.mrf.mxu0 }
 0x1e7   :  { %1249 = vst [vmem:[#allocation6 + $0x10] sm:$0xff] %v1187_v23  ;;  %v1205_v11 = vadd.f32 %v1676_v13, %v1076_v40  ;;  %v1070_v2 = vadd.f32 %v1069_v10, %v903_v50 }
 0x1e8   :  { %v1635_v34 = vpop.f32.mrf.mxu0 }
 0x1e9   :  { %1252 = vst [vmem:[#allocation6 + $0x28] sm:$0xff] %v1205_v11  ;;  %v1199_v51 = vadd.f32 %v1198_v54, %v1070_v2  ;;  %v1088_v62 = vadd.f32 %v1635_v34, %v927_v28 }
 0x1ea   :  { %v1081_v19 = vpop.f32.mrf.mxu0 }
 0x1eb   :  { %1251 = vst [vmem:[#allocation6 + $0x20] sm:$0xff] %v1199_v51  ;;  %v1217_v5 = vadd.f32 %v1679_v55, %v1088_v62  ;;  %v1082_v25 = vadd.f32 %v1081_v19, %v919_v57 }
 0x1ed   :  { %1254 = vst [vmem:[#allocation6 + $0x38] sm:$0xff] %v1217_v5  ;;  %v1211_v56 = vadd.f32 %v1210_v17, %v1082_v25 }
 0x1ef   :  { %1253 = vst [vmem:[#allocation6 + $0x30] sm:$0xff] %v1211_v56 }
 0x1f0   :  { %1751 = shalt.err (!%p1748_p9)
}
 0x1f1   :  { %1266 = dma.vmem_to_hbm [thread:$0]  %s1261_s8, 1024, %s2312_s3, [#allocation5], %s1765_s15, %s1765_s15, %s1766_s16  }
 0x1f2   :  { %1762 = dma.done.wait [#allocation5], 1024  }
 0x1f3   :  { %1763 = vsyncadd [#allocation5], 4294966272 }
 0x1f4   :  { %1270 = vsyncpa [#allocation4], 1 }
 0x1f5   :  { %1271 = vsyncpa [#allocation5], 1 }

</bundles_post_ra>
